<compile_context>
chip_gen: v5e
topology: v5e:2x2
jax: 0.10.0
libtpu: 0.0.40
codegen_flags: <defaults>
</compile_context>

<pallas_src>
import jax
import jax.numpy as jnp
from jax.experimental import pallas as pl
from jax.experimental.pallas import tpu as pltpu


# Packed-parameter row layout. W2 is placed at a sublane-aligned (multiple of 8)
# row offset so the in-kernel static slices start on an (8,128) tile boundary.
_C_IN = 64
_C_MID = 240
_C_OUT = 40
_W2_ROW0 = 72                      # rows 72:112 -> W2 (40, 240)
_PACK_ROWS = _W2_ROW0 + _C_OUT     # 112


def _se_kernel(v_ref, p_ref, x_ref, o_ref):
    # v_ref: (1, 64)     x69 as a lane-dense row
    # p_ref: (112, 240)  packed [ W1^T (64,240) ; b1 (1,240) ; pad ; W2 (40,240) ]
    # x_ref: (240, HW)   x66 flattened over spatial
    # o_ref: (40, HW)
    w1t = p_ref[0:_C_IN, :]                        # (64, 240)
    b1 = p_ref[_C_IN:_C_IN + 1, :]                 # (1, 240)
    w2 = p_ref[_W2_ROW0:_W2_ROW0 + _C_OUT, :]      # (40, 240)

    # Squeeze 1x1 conv as a lane-dense row matmul: (1,64) @ (64,240) -> (1,240)
    s = jnp.dot(v_ref[...], w1t, preferred_element_type=jnp.float32) + b1
    # Hardsigmoid (PyTorch): relu6(x + 3) / 6 == clip(x/6 + 0.5, 0, 1)
    s = jnp.clip(s * (1.0 / 6.0) + 0.5, 0.0, 1.0)

    # Fold the SE scale into W2's columns:
    #   sum_k W2[o,k] * s[k] * X[k,j] == ((W2 * s) @ X)[o,j]
    # -> 40x240 VPU multiply (cheap sublane broadcast of the (1,240) row)
    #    instead of a 240x196 broadcast multiply, then one MXU matmul.
    o_ref[...] = jnp.dot(w2 * s, x_ref[...], preferred_element_type=jnp.float32)


def prepare_params(w1, b1, w2, dtype=jnp.float32):
    """One-time weight packing; call OUTSIDE the hot path.

    w1: (240, 64, 1, 1), b1: (240,), w2: (40, 240, 1, 1)
    Returns a single (112, 240) buffer: rows 0:64 = W1^T, row 64 = b1,
    rows 65:72 = zero pad, rows 72:112 = W2.
    """
    w1t = w1.reshape(_C_MID, _C_IN).T.astype(dtype)     # (64, 240)
    b1r = b1.reshape(1, _C_MID).astype(dtype)           # (1, 240)
    w2r = w2.reshape(_C_OUT, _C_MID).astype(dtype)      # (40, 240)
    packed = jnp.zeros((_PACK_ROWS, _C_MID), dtype)
    packed = packed.at[0:_C_IN, :].set(w1t)
    packed = packed.at[_C_IN:_C_IN + 1, :].set(b1r)
    packed = packed.at[_W2_ROW0:_W2_ROW0 + _C_OUT, :].set(w2r)
    return packed


@jax.jit
def se_block(x69, x66, packed):
    """x69: (1, 64, 1, 1), x66: (1, 240, 14, 14), packed: (112, 240)
       -> (1, 40, 14, 14) NCHW."""
    n, c_in, _, _ = x69.shape
    _, c_mid, h, w = x66.shape
    assert n == 1 and c_in == _C_IN and c_mid == _C_MID

    v = x69.reshape(1, c_in)            # (1, 64)   lane-dense row (free reshape)
    x_mat = x66.reshape(c_mid, h * w)   # (240, HW) free reshape

    out = pl.pallas_call(
        _se_kernel,
        out_shape=jax.ShapeDtypeStruct((_C_OUT, h * w), jnp.float32),
        in_specs=[
            pl.BlockSpec(memory_space=pltpu.MemorySpace.VMEM),
            pl.BlockSpec(memory_space=pltpu.MemorySpace.VMEM),
            pl.BlockSpec(memory_space=pltpu.MemorySpace.VMEM),
        ],
        out_specs=pl.BlockSpec(memory_space=pltpu.MemorySpace.VMEM),
    )(v, packed, x_mat)

    return out.reshape(1, _C_OUT, h, w)


def _reference(x69, x66, w1, b1, w2):
    v = x69.reshape(_C_IN, 1)
    s = w1.reshape(_C_MID, _C_IN) @ v + b1.reshape(_C_MID, 1)
    s = jnp.clip(s / 6.0 + 0.5, 0.0, 1.0)
    x72 = s * x66.reshape(_C_MID, 14 * 14)
    return (w2.reshape(_C_OUT, _C_MID) @ x72).reshape(1, _C_OUT, 14, 14)


if __name__ == "__main__":
    key = jax.random.PRNGKey(0)
    k1, k2, k3, k4, k5 = jax.random.split(key, 5)

    # Inputs consistent with the module's forward.
    x69 = jax.random.normal(k1, (1, 64, 1, 1), dtype=jnp.float32)
    x66 = jax.random.normal(k2, (1, 240, 14, 14), dtype=jnp.float32)

    # Deterministic parameter init (shapes from the Conv2d definitions).
    w1 = jax.random.normal(k3, (240, 64, 1, 1), dtype=jnp.float32) * 0.05
    b1 = jax.random.normal(k4, (240,), dtype=jnp.float32) * 0.05
    w2 = jax.random.normal(k5, (40, 240, 1, 1), dtype=jnp.float32) * 0.05

    # One-time packing outside the hot path.
    packed = jax.block_until_ready(prepare_params(w1, b1, w2))

    out = jax.block_until_ready(se_block(x69, x66, packed))

    ref = _reference(x69, x66, w1, b1, w2)
    assert out.shape == (1, 40, 14, 14)
    max_err = float(jnp.max(jnp.abs(out - ref)))
    assert jnp.allclose(out, ref, atol=1e-4, rtol=1e-4), max_err

    print("KERNEL_OK")
</pallas_src>

<mosaic_0001>
module attributes {stable_mosaic.version = 11 : i64} {
  func.func @_se_kernel(%arg0: memref<1x64xf32, #tpu.memory_space<vmem>>, %arg1: memref<112x240xf32, #tpu.memory_space<vmem>>, %arg2: memref<240x196xf32, #tpu.memory_space<vmem>>, %arg3: memref<40x196xf32, #tpu.memory_space<vmem>>) attributes {dimension_semantics = [], scalar_prefetch = 0 : i64, scratch_operands = 0 : i64, tpu.core_type = #tpu.core_type<tc>} {
    %c0 = arith.constant 0 : index
    %c0_0 = arith.constant 0 : index
    %0 = vector.load %arg1[%c0, %c0_0] : memref<112x240xf32, #tpu.memory_space<vmem>>, vector<64x240xf32>
    %c64 = arith.constant 64 : index
    %c0_1 = arith.constant 0 : index
    %1 = vector.load %arg1[%c64, %c0_1] : memref<112x240xf32, #tpu.memory_space<vmem>>, vector<1x240xf32>
    %c72 = arith.constant 72 : index
    %c0_2 = arith.constant 0 : index
    %2 = vector.load %arg1[%c72, %c0_2] : memref<112x240xf32, #tpu.memory_space<vmem>>, vector<40x240xf32>
    %c0_3 = arith.constant 0 : index
    %c0_4 = arith.constant 0 : index
    %3 = vector.load %arg0[%c0_3, %c0_4] : memref<1x64xf32, #tpu.memory_space<vmem>>, vector<1x64xf32>
    %cst = arith.constant dense<0.000000e+00> : vector<1x240xf32>
    %4 = tpu.matmul %3, %0, %cst {dimension_numbers = #tpu.dot_dimension_numbers<[1], [0], [0], [1], [0, 0, 1, 1], [], []>} : vector<1x64xf32>, vector<64x240xf32>, vector<1x240xf32> -> vector<1x240xf32>
    %5 = arith.addf %4, %1 : vector<1x240xf32>
    %cst_5 = arith.constant 0.166666672 : f32
    %6 = vector.broadcast %cst_5 : f32 to vector<1x240xf32>
    %7 = arith.mulf %5, %6 : vector<1x240xf32>
    %cst_6 = arith.constant 5.000000e-01 : f32
    %8 = vector.broadcast %cst_6 : f32 to vector<1x240xf32>
    %9 = arith.addf %7, %8 : vector<1x240xf32>
    %cst_7 = arith.constant 0.000000e+00 : f32
    %cst_8 = arith.constant 1.000000e+00 : f32
    %10 = vector.broadcast %cst_7 : f32 to vector<1x240xf32>
    %11 = arith.maximumf %10, %9 : vector<1x240xf32>
    %12 = vector.broadcast %cst_8 : f32 to vector<1x240xf32>
    %13 = arith.minimumf %12, %11 : vector<1x240xf32>
    %14 = vector.broadcast %13 : vector<1x240xf32> to vector<40x240xf32>
    %15 = arith.mulf %2, %14 : vector<40x240xf32>
    %c0_9 = arith.constant 0 : index
    %c0_10 = arith.constant 0 : index
    %16 = vector.load %arg2[%c0_9, %c0_10] : memref<240x196xf32, #tpu.memory_space<vmem>>, vector<240x196xf32>
    %cst_11 = arith.constant dense<0.000000e+00> : vector<40x196xf32>
    %17 = tpu.matmul %15, %16, %cst_11 {dimension_numbers = #tpu.dot_dimension_numbers<[1], [0], [0], [1], [0, 0, 1, 1], [], []>} : vector<40x240xf32>, vector<240x196xf32>, vector<40x196xf32> -> vector<40x196xf32>
    %c0_12 = arith.constant 0 : index
    %c0_13 = arith.constant 0 : index
    %18 = vector.load %arg3[%c0_12, %c0_13] : memref<40x196xf32, #tpu.memory_space<vmem>>, vector<40x196xf32>
    tpu.vector_store %arg3[%c0_12, %c0_13], %17 {strides = array<i32>} : memref<40x196xf32, #tpu.memory_space<vmem>>, vector<40x196xf32>,
    return
  }
}

</mosaic_0001>

<bundles_post_ra>
// kernel: se_block.1
= control target key start
LH: loop header
LB: loop body
LE: loop exit
PB: predicated region body
PF: predicated region fallthrough
CT: control target
= control target key end

     0   :  { %vm48_vm0 = vcmask 523264   ;;  %vm172_vm1 = vcmask 916480   ;;  %vm317_vm2 = vcmask 556032   ;;  %s733_s1 = inlined_call_operand.vmem [shape: f32[112,240], index: 1, kind: input, shape index: {}]   ;;  %s734_s2 = inlined_call_operand.vmem [shape: f32[240,196], index: 2, kind: input, shape index: {}]   ;;  %s735_s0 = inlined_call_operand.vmem [shape: f32[1,64], index: 0, kind: input, shape index: {}]   ;;  %s736_s3 = inlined_call_operand.vmem [shape: f32[40,196], index: 3, kind: output, shape index: {}]  }
   0x1   :  { %v28_v0 = vld [vmem:[%s733_s1 + $0x70] sm:$0xff]  ;;  %v29_v1 = vld [vmem:[%s733_s1 + $0x78] sm:$0xff]  ;;  %v26_v2 = vld [vmem:[%s733_s1 + $0x60] sm:$0xff] }
   0x2   :  { %60 = vmatpush.msra.mxu0 %v28_v0  ;;  %80 = vmatpush.msra.mxu1 %v29_v1  ;;  %v27_v3 = vld [vmem:[%s733_s1 + $0x68] sm:$0xff]  ;;  %v24_v4 = vld [vmem:[%s733_s1 + $0x50] sm:$0xff]  ;;  %v25_v5 = vld [vmem:[%s733_s1 + $0x58] sm:$0xff] }
   0x3   :  { %v22_v6 = vld [vmem:[%s733_s1 + $0x40] sm:$0xff]  ;;  %v23_v7 = vld [vmem:[%s733_s1 + $0x48] sm:$0xff]  ;;  %v142_v8 = vld [vmem:[%s734_s2 + $0xf0] sm:$0xff] }
   0x4   :  { %61 = vmatpush.msra.mxu0 %v26_v2  ;;  %81 = vmatpush.msra.mxu1 %v27_v3  ;;  %v20_v9 = vld [vmem:[%s733_s1 + $0x30] sm:$0xff]  ;;  %v21_v10 = vld [vmem:[%s733_s1 + $0x38] sm:$0xff]  ;;  %v140_v11 = vld [vmem:[%s734_s2 + $0xe0] sm:$0xff] }
   0x5   :  { %188 = vmatpush.msra.mxu2 %v142_v8  ;;  %v138_v12 = vld [vmem:[%s734_s2 + $0xd0] sm:$0xff]  ;;  %v18_v14 = vld [vmem:[%s733_s1 + $0x20] sm:$0xff]  ;;  %v19_v15 = vld [vmem:[%s733_s1 + $0x28] sm:$0xff] }
   0x6   :  { %62 = vmatpush.msra.mxu0 %v24_v4  ;;  %82 = vmatpush.msra.mxu1 %v25_v5  ;;  %v170_v13 = vld [vmem:[%s734_s2 + $0x1d0] sm:$0xff]  ;;  %v168_v16 = vld [vmem:[%s734_s2 + $0x1c0] sm:$0xff]  ;;  %v17_v19 = vld [vmem:[%s733_s1 + $0x18] sm:$0xff] }
   0x7   :  { %189 = vmatpush.msra.mxu2 %v140_v11  ;;  %222 = vmatpush.msra.mxu3 %v170_v13  ;;  %v136_v17 = vld [vmem:[%s734_s2 + $0xc0] sm:$0xff]  ;;  %v16_v18 = vld [vmem:[%s733_s1 + $0x10] sm:$0xff]  ;;  %v15_v24 = vld [vmem:[%s733_s1 + $0x8] sm:$0xff] }
   0x8   :  { %63 = vmatpush.msra.mxu0 %v22_v6  ;;  %83 = vmatpush.msra.mxu1 %v23_v7  ;;  %v166_v20 = vld [vmem:[%s734_s2 + $0x1b0] sm:$0xff]  ;;  %v164_v22 = vld [vmem:[%s734_s2 + $0x1a0] sm:$0xff]  ;;  %v461_v26 = vld [vmem:[%s734_s2 + $0xf8] sm:$0xff] }
   0x9   :  { %190 = vmatpush.msra.mxu2 %v138_v12  ;;  %223 = vmatpush.msra.mxu3 %v168_v16  ;;  %v134_v21 = vld [vmem:[%s734_s2 + $0xb0] sm:$0xff]  ;;  %v14_v23 = vld [vmem:[%s733_s1] sm:$0xff]  ;;  %v171_v27 = vld [vmem:[%s734_s2 + $0x1d8] sm:$0xff] }
   0xa   :  { %64 = vmatpush.msra.mxu0 %v20_v9  ;;  %84 = vmatpush.msra.mxu1 %v21_v10  ;;  %v42_v25 = vld [vmem:[%s735_s0] sm:$0x1]  ;;  %v162_v29 = vld [vmem:[%s734_s2 + $0x190] sm:$0xff]  ;;  %v475_v30 = vld [vmem:[%s734_s2 + $0xe8] sm:$0xff] }
   0xb   :  { %191 = vmatpush.msra.mxu2 %v136_v17  ;;  %224 = vmatpush.msra.mxu3 %v166_v20  ;;  %v132_v28 = vld [vmem:[%s734_s2 + $0xa0] sm:$0xff]  ;;  %v169_v31 = vld [vmem:[%s734_s2 + $0x1c8] sm:$0xff]  ;;  %v130_v32 = vld [vmem:[%s734_s2 + $0x90] sm:$0xff] }
   0xc   :  { %65 = vmatpush.msra.mxu0 %v18_v14  ;;  %85 = vmatpush.msra.mxu1 %v19_v15  ;;  %v160_v33 = vld [vmem:[%s734_s2 + $0x180] sm:$0xff]  ;;  %v490_v34 = vld [vmem:[%s734_s2 + $0xd8] sm:$0xff]  ;;  %v502_v37 = vld [vmem:[%s734_s2 + $0xc8] sm:$0xff] }
   0xd   :  { %192 = vmatpush.msra.mxu2 %v134_v21  ;;  %225 = vmatpush.msra.mxu3 %v164_v22  ;;  %v167_v35 = vld [vmem:[%s734_s2 + $0x1b8] sm:$0xff]  ;;  %v128_v36 = vld [vmem:[%s734_s2 + $0x80] sm:$0xff]  ;;  %v165_v38 = vld [vmem:[%s734_s2 + $0x1a8] sm:$0xff] }
   0xe   :  { %66 = vmatpush.msra.mxu0 %v16_v18  ;;  %86 = vmatpush.msra.mxu1 %v17_v19  ;;  %v511_v39 = vld [vmem:[%s734_s2 + $0xb8] sm:$0xff]  ;;  %v520_v41 = vld [vmem:[%s734_s2 + $0xa8] sm:$0xff]  ;;  %v126_v45 = vld [vmem:[%s734_s2 + $0x70] sm:$0xff] }
   0xf   :  { %193 = vmatpush.msra.mxu2 %v132_v28  ;;  %226 = vmatpush.msra.mxu3 %v162_v29  ;;  %v163_v40 = vld [vmem:[%s734_s2 + $0x198] sm:$0xff]  ;;  %v161_v42 = vld [vmem:[%s734_s2 + $0x188] sm:$0xff]  ;;  %v158_v46 = vld [vmem:[%s734_s2 + $0x170] sm:$0xff] }
  0x10   :  { %67 = vmatpush.msra.mxu0 %v14_v23  ;;  %87 = vmatpush.msra.mxu1 %v15_v24  ;;  %v529_v43 = vld [vmem:[%s734_s2 + $0x98] sm:$0xff]  ;;  %v535_v44 = vld [vmem:[%s734_s2 + $0x88] sm:$0xff]  ;;  %v124_v49 = vld [vmem:[%s734_s2 + $0x60] sm:$0xff] }
  0x11   :  { %332 = vmatmul.msk.f32.vlgmr.msra.gmra.mxu0 %vm48_vm0, %v42_v25  ;;  %333 = vmatmul.msk.f32.vlgmr.msra.gmra.mxu1 %vm48_vm0, %v42_v25  ;;  %v548_v47 = vld [vmem:[%s734_s2 + $0x78] sm:$0xff]  ;;  %v156_v50 = vld [vmem:[%s734_s2 + $0x160] sm:$0xff]  ;;  %v563_v51 = vld [vmem:[%s734_s2 + $0x68] sm:$0xff] }
  0x12   :  { %252 = vmatpush.msrb.mxu0 %v461_v26  ;;  %286 = vmatpush.msrb.mxu1 %v171_v27  ;;  %v159_v48 = vld [vmem:[%s734_s2 + $0x178] sm:$0xff]  ;;  %v157_v52 = vld [vmem:[%s734_s2 + $0x168] sm:$0xff]  ;;  %v122_v53 = vld [vmem:[%s734_s2 + $0x50] sm:$0xff] }
  0x13   :  { %194 = vmatpush.msra.mxu2 %v130_v32  ;;  %227 = vmatpush.msra.mxu3 %v160_v33  ;;  %v154_v54 = vld [vmem:[%s734_s2 + $0x150] sm:$0xff]  ;;  %v578_v55 = vld [vmem:[%s734_s2 + $0x58] sm:$0xff]  ;;  %v120_v57 = vld [vmem:[%s734_s2 + $0x40] sm:$0xff] }
  0x14   :  { %253 = vmatpush.msrb.mxu0 %v475_v30  ;;  %287 = vmatpush.msrb.mxu1 %v169_v31  ;;  %v155_v56 = vld [vmem:[%s734_s2 + $0x158] sm:$0xff]  ;;  %v152_v58 = vld [vmem:[%s734_s2 + $0x140] sm:$0xff]  ;;  %v121_v59 = vld [vmem:[%s734_s2 + $0x48] sm:$0xff] }
  0x15   :  { %195 = vmatpush.msra.mxu2 %v128_v36  ;;  %228 = vmatpush.msra.mxu3 %v158_v46  ;;  %v153_v60 = vld [vmem:[%s734_s2 + $0x148] sm:$0xff]  ;;  %v118_v61 = vld [vmem:[%s734_s2 + $0x30] sm:$0xff]  ;;  %v119_v63 = vld [vmem:[%s734_s2 + $0x38] sm:$0xff] }
  0x16   :  { %254 = vmatpush.msrb.mxu0 %v490_v34  ;;  %288 = vmatpush.msrb.mxu1 %v167_v35  ;;  %v150_v62 = vld [vmem:[%s734_s2 + $0x130] sm:$0xff]  ;;  %v151_v0 = vld [vmem:[%s734_s2 + $0x138] sm:$0xff]  ;;  %v116_v1 = vld [vmem:[%s734_s2 + $0x20] sm:$0xff] }
  0x17   :  { %196 = vmatpush.msra.mxu2 %v126_v45  ;;  %229 = vmatpush.msra.mxu3 %v156_v50  ;;  %v148_v2 = vld [vmem:[%s734_s2 + $0x120] sm:$0xff]  ;;  %v117_v3 = vld [vmem:[%s734_s2 + $0x28] sm:$0xff]  ;;  %v114_v5 = vld [vmem:[%s734_s2 + $0x10] sm:$0xff] }
  0x18   :  { %255 = vmatpush.msrb.mxu0 %v502_v37  ;;  %289 = vmatpush.msrb.mxu1 %v165_v38  ;;  %v149_v4 = vld [vmem:[%s734_s2 + $0x128] sm:$0xff]  ;;  %v146_v6 = vld [vmem:[%s734_s2 + $0x110] sm:$0xff]  ;;  %v115_v7 = vld [vmem:[%s734_s2 + $0x18] sm:$0xff] }
  0x19   :  { %197 = vmatpush.msra.mxu2 %v124_v49  ;;  %230 = vmatpush.msra.mxu3 %v154_v54  ;;  %v147_v8 = vld [vmem:[%s734_s2 + $0x118] sm:$0xff]  ;;  %v112_v9 = vld [vmem:[%s734_s2] sm:$0xff]  ;;  %v113_v11 = vld [vmem:[%s734_s2 + $0x8] sm:$0xff] }
  0x1a   :  { %256 = vmatpush.msrb.mxu0 %v511_v39  ;;  %290 = vmatpush.msrb.mxu1 %v163_v40  ;;  %v144_v10 = vld [vmem:[%s734_s2 + $0x100] sm:$0xff]  ;;  %v145_v12 = vld [vmem:[%s734_s2 + $0x108] sm:$0xff]  ;;  %v32_v28 = vld [vmem:[%s733_s1 + $0x90] sm:$0xff] }
  0x1b   :  { %198 = vmatpush.msra.mxu2 %v122_v53  ;;  %231 = vmatpush.msra.mxu3 %v152_v58  ;;  %v331_v13 = vld [vmem:[%s733_s1 + $0x80] ss:$8 sm:$0x3]  ;;  %v33_v29 = vld [vmem:[%s733_s1 + $0x98] sm:$0xff]  ;;  %v36_v38 = vld [vmem:[%s733_s1 + $0xb0] sm:$0xff] }
  0x1c   :  { %257 = vmatpush.msrb.mxu0 %v520_v41  ;;  %291 = vmatpush.msrb.mxu1 %v161_v42  ;;  %v44_v14 = vperm.slane %v331_v13, 0  ;;  %v45_v15 = vperm.slane %v331_v13, 1  ;;  %v35_v35 = vld [vmem:[%s733_s1 + $0xa8] sm:$0xff]  ;;  %v38_v42 = vld [vmem:[%s733_s1 + $0xc0] sm:$0xff]  ;;  %v40_v46 = vld [vmem:[%s733_s1 + $0xd0] sm:$0xff] }
  0x1d   :  { %199 = vmatpush.msra.mxu2 %v120_v57  ;;  %232 = vmatpush.msra.mxu3 %v150_v62 }
  0x1e   :  { %258 = vmatpush.msrb.mxu0 %v529_v43  ;;  %292 = vmatpush.msrb.mxu1 %v159_v48 }
  0x1f   :  { %200 = vmatpush.msra.mxu2 %v118_v61  ;;  %233 = vmatpush.msra.mxu3 %v148_v2 }
  0x20   :  { %259 = vmatpush.msrb.mxu0 %v535_v44  ;;  %293 = vmatpush.msrb.mxu1 %v157_v52 }
  0x21   :  { %201 = vmatpush.msra.mxu2 %v116_v1  ;;  %234 = vmatpush.msra.mxu3 %v146_v6 }
  0x22   :  { %260 = vmatpush.msrb.mxu0 %v548_v47  ;;  %294 = vmatpush.msrb.mxu1 %v155_v56 }
  0x23   :  { %202 = vmatpush.msra.mxu2 %v114_v5  ;;  %235 = vmatpush.msra.mxu3 %v144_v10 }
  0x24   :  { %261 = vmatpush.msrb.mxu0 %v563_v51  ;;  %295 = vmatpush.msrb.mxu1 %v153_v60 }
  0x25   :  { %203 = vmatpush.msra.mxu2 %v112_v9  ;;  %344 = vmatpush.msrb.mxu3 %v461_v26 }
  0x26   :  { %262 = vmatpush.msrb.mxu0 %v578_v55  ;;  %296 = vmatpush.msrb.mxu1 %v151_v0 }
  0x27   :  { %345 = vmatpush.msrb.mxu3 %v475_v30 }
  0x28   :  { %263 = vmatpush.msrb.mxu0 %v121_v59  ;;  %297 = vmatpush.msrb.mxu1 %v149_v4 }
  0x29   :  { %346 = vmatpush.msrb.mxu3 %v490_v34  ;;  %v34_v34 = vld [vmem:[%s733_s1 + $0xa0] sm:$0xff] }
  0x2a   :  { %264 = vmatpush.msrb.mxu0 %v119_v63  ;;  %298 = vmatpush.msrb.mxu1 %v147_v8 }
  0x2b   :  { %347 = vmatpush.msrb.mxu3 %v502_v37 }
  0x2c   :  { %265 = vmatpush.msrb.mxu0 %v117_v3  ;;  %299 = vmatpush.msrb.mxu1 %v145_v12 }
  0x2d   :  { %348 = vmatpush.msrb.mxu3 %v511_v39  ;;  %v37_v39 = vld [vmem:[%s733_s1 + $0xb8] sm:$0xff] }
  0x2e   :  { %266 = vmatpush.msrb.mxu0 %v115_v7 }
  0x2f   :  { %349 = vmatpush.msrb.mxu3 %v520_v41 }
  0x30   :  { %267 = vmatpush.msrb.mxu0 %v113_v11 }
  0x31   :  { %350 = vmatpush.msrb.mxu3 %v529_v43  ;;  %v39_v43 = vld [vmem:[%s733_s1 + $0xc8] sm:$0xff] }
  0x33   :  { %351 = vmatpush.msrb.mxu3 %v535_v44 }
  0x35   :  { %352 = vmatpush.msrb.mxu3 %v548_v47  ;;  %v41_v47 = vld [vmem:[%s733_s1 + $0xd8] sm:$0xff] }
  0x37   :  { %353 = vmatpush.msrb.mxu3 %v563_v51 }
  0x39   :  { %354 = vmatpush.msrb.mxu3 %v578_v55 }
  0x3b   :  { %355 = vmatpush.msrb.mxu3 %v121_v59 }
  0x3d   :  { %356 = vmatpush.msrb.mxu3 %v119_v63 }
  0x3f   :  { %357 = vmatpush.msrb.mxu3 %v117_v3 }
  0x41   :  { %358 = vmatpush.msrb.mxu3 %v115_v7 }
  0x43   :  { %359 = vmatpush.msrb.mxu3 %v113_v11 }
  0x8e   :  { %v69_v16 = vpop.f32.mrf.mxu0  ;;  %v89_v17 = vpop.f32.mrf.mxu1 }
  0x8f   :  { %v70_v18 = vadd.f32 %v69_v16, %v44_v14  ;;  %v90_v19 = vadd.f32 %v89_v17, %v45_v15 }
  0x91   :  { %v92_v20 = vmul.f32 0.16666667, %v70_v18  ;;  %v93_v21 = vmul.f32 0.16666667, %v90_v19 }
  0x93   :  { %v94_v22 = vadd.f32 0.5, %v92_v20  ;;  %v95_v23 = vadd.f32 0.5, %v93_v21 }
  0x95   :  { %v96_v24 = vmax.f32 %v94_v22, 0.0  ;;  %v97_v25 = vmax.f32 %v95_v23, 0.0 }
  0x97   :  { %v98_v26 = vmin.f32 %v96_v24, 1.0  ;;  %v99_v27 = vmin.f32 %v97_v25, 1.0 }
  0x99   :  { %v100_v30 = vperm.slane %v98_v26, 0  ;;  %v101_v31 = vperm.slane %v99_v27, 0 }
  0x9b   :  { %v102_v32 = vmul.f32 %v100_v30, %v32_v28  ;;  %v103_v33 = vmul.f32 %v101_v31, %v33_v29  ;;  %v104_v36 = vmul.f32 %v100_v30, %v34_v34  ;;  %v105_v37 = vmul.f32 %v101_v31, %v35_v35 }
  0x9c   :  { %v106_v40 = vmul.f32 %v100_v30, %v36_v38  ;;  %v107_v41 = vmul.f32 %v101_v31, %v37_v39  ;;  %v108_v44 = vmul.f32 %v100_v30, %v38_v42  ;;  %v109_v45 = vmul.f32 %v101_v31, %v39_v43 }
  0x9d   :  { %204 = vmatmul.f32.vlgmr.msra.gmra.mxu2 %v102_v32  ;;  %334 = vmatmul.msk.f32.vlgmr.msra.gmra.mxu3 %vm172_vm1, %v103_v33  ;;  %v110_v48 = vmul.f32 %v100_v30, %v40_v46  ;;  %v111_v49 = vmul.f32 %v101_v31, %v41_v47 }
  0x9e   :  { %268 = vmatmul.f32.vlgmr.msrb.gmra.mxu0 %v102_v32  ;;  %339 = vmatmul.msk.f32.vlgmr.msrb.gmra.mxu1 %vm172_vm1, %v103_v33 }
  0xa5   :  { %207 = vmatmul.f32.gmra.mxu2 %v104_v36  ;;  %335 = vmatmul.msk.f32.gmra.mxu3 %vm172_vm1, %v105_v37 }
  0xa6   :  { %271 = vmatmul.f32.gmra.mxu0 %v104_v36  ;;  %340 = vmatmul.msk.f32.gmra.mxu1 %vm172_vm1, %v105_v37 }
  0xad   :  { %210 = vmatmul.f32.gmra.mxu2 %v106_v40  ;;  %336 = vmatmul.msk.f32.gmra.mxu3 %vm172_vm1, %v107_v41 }
  0xae   :  { %274 = vmatmul.f32.gmra.mxu0 %v106_v40  ;;  %341 = vmatmul.msk.f32.gmra.mxu1 %vm172_vm1, %v107_v41 }
  0xb5   :  { %213 = vmatmul.f32.gmra.mxu2 %v108_v44  ;;  %337 = vmatmul.msk.f32.gmra.mxu3 %vm172_vm1, %v109_v45 }
  0xb6   :  { %277 = vmatmul.f32.gmra.mxu0 %v108_v44  ;;  %342 = vmatmul.msk.f32.gmra.mxu1 %vm172_vm1, %v109_v45 }
  0xbd   :  { %216 = vmatmul.f32.gmra.mxu2 %v110_v48  ;;  %338 = vmatmul.msk.f32.gmra.mxu3 %vm172_vm1, %v111_v49 }
  0xbe   :  { %343 = vmatmul.msk.f32.gmra.mxu1 %vm172_vm1, %v111_v49 }
  0xc5   :  { %280 = vmatmul.f32.vlgmr.msrb.gmra.mxu3 %v110_v48 }
 0x11b   :  { %v269_v50 = vpop.f32.mrf.mxu0  ;;  %v301_v51 = vpop.f32.mrf.mxu1 }
 0x11c   :  { %v302_v52 = vadd.f32 %v301_v51, %v269_v50 }
 0x11e   :  { %318 = vst.msk [vmem:[%s736_s3 + $0x8] sm:$0xff] %vm317_vm2, %v302_v52 }
 0x120   :  { %v205_v53 = vpop.f32.mrf.mxu2  ;;  %v237_v54 = vpop.f32.mrf.mxu3 }
 0x121   :  { %v238_v55 = vadd.f32 %v237_v54, %v205_v53 }
 0x123   :  { %316 = vst [vmem:[%s736_s3] sm:$0xff] %v238_v55  ;;  %v272_v56 = vpop.f32.mrf.mxu0  ;;  %v304_v57 = vpop.f32.mrf.mxu1 }
 0x124   :  { %v305_v58 = vadd.f32 %v304_v57, %v272_v56 }
 0x126   :  { %320 = vst.msk [vmem:[%s736_s3 + $0x18] sm:$0xff] %vm317_vm2, %v305_v58 }
 0x128   :  { %v208_v59 = vpop.f32.mrf.mxu2  ;;  %v240_v60 = vpop.f32.mrf.mxu3 }
 0x129   :  { %v241_v61 = vadd.f32 %v240_v60, %v208_v59 }
 0x12b   :  { %319 = vst [vmem:[%s736_s3 + $0x10] sm:$0xff] %v241_v61  ;;  %v275_v62 = vpop.f32.mrf.mxu0  ;;  %v307_v63 = vpop.f32.mrf.mxu1 }
 0x12c   :  { %v308_v0 = vadd.f32 %v307_v63, %v275_v62 }
 0x12e   :  { %322 = vst.msk [vmem:[%s736_s3 + $0x28] sm:$0xff] %vm317_vm2, %v308_v0 }
 0x130   :  { %v211_v1 = vpop.f32.mrf.mxu2  ;;  %v243_v2 = vpop.f32.mrf.mxu3 }
 0x131   :  { %v244_v3 = vadd.f32 %v243_v2, %v211_v1 }
 0x133   :  { %321 = vst [vmem:[%s736_s3 + $0x20] sm:$0xff] %v244_v3  ;;  %v278_v4 = vpop.f32.mrf.mxu0  ;;  %v310_v5 = vpop.f32.mrf.mxu1 }
 0x134   :  { %v311_v6 = vadd.f32 %v310_v5, %v278_v4 }
 0x136   :  { %324 = vst.msk [vmem:[%s736_s3 + $0x38] sm:$0xff] %vm317_vm2, %v311_v6 }
 0x138   :  { %v214_v7 = vpop.f32.mrf.mxu2  ;;  %v246_v8 = vpop.f32.mrf.mxu3 }
 0x139   :  { %v247_v9 = vadd.f32 %v246_v8, %v214_v7 }
 0x13b   :  { %323 = vst [vmem:[%s736_s3 + $0x30] sm:$0xff] %v247_v9  ;;  %v313_v13 = vpop.f32.mrf.mxu1 }
 0x140   :  { %v217_v10 = vpop.f32.mrf.mxu2  ;;  %v249_v11 = vpop.f32.mrf.mxu3 }
 0x141   :  { %v250_v12 = vadd.f32 %v249_v11, %v217_v10 }
 0x143   :  { %325 = vst [vmem:[%s736_s3 + $0x40] sm:$0xff] %v250_v12 }
 0x148   :  { %v281_v14 = vpop.f32.mrf.mxu3 }
 0x149   :  { %v314_v15 = vadd.f32 %v313_v13, %v281_v14 }
 0x14b   :  { %326 = vst.msk [vmem:[%s736_s3 + $0x48] sm:$0xff] %vm317_vm2, %v314_v15 }

</bundles_post_ra>
